<compile_context>
chip_gen: v7x
topology: tpu7x:2x2x1
jax: 0.10.0
libtpu: 0.0.40
codegen_flags: <defaults>
</compile_context>

<pallas_src>
import jax
import jax.numpy as jnp
from jax.experimental import pallas as pl
from jax.experimental.pallas import tpu as pltpu


def _round_up(x: int, m: int) -> int:
    return ((x + m - 1) // m) * m


# Conservative single-TC VMEM budget (v7x has 64 MiB physical per TC).
_VMEM_BUDGET = 48 * 1024 * 1024


def linear_softmax_kernel(x_ref, w_ref, b_ref, o_ref):
    # x_ref: (TB, IN)       f32  -- one batch tile
    # w_ref: (IN, OUT_PAD)  bf16 -- resident, pre-transposed + pre-cast in wrapper
    # b_ref: (1, OUT_PAD)   f32  -- resident; padded lanes hold -1e30
    # o_ref: (TB, OUT_PAD)  f32
    xb = x_ref[...].astype(jnp.bfloat16)
    # canonical (M,K)x(K,N) contraction -> MXU, f32 accumulation
    logits = jnp.dot(xb, w_ref[...], preferred_element_type=jnp.float32)
    logits = logits + b_ref[...]                       # bias broadcast (f32)

    # numerically-stable softmax along dim=1 (feature axis)
    m = jnp.max(logits, axis=1, keepdims=True)
    e = jnp.exp(logits - m)
    denom = jnp.sum(e, axis=1, keepdims=True)
    r = pl.reciprocal(denom, approx=True)              # EUP slot, ~free
    r = r * (2.0 - denom * r)                          # one Newton step (VPU) -> ~exact
    o_ref[...] = (e * r).astype(o_ref.dtype)


def _pick_tb_and_vmem(B, IN, out_pad, block_b):
    """Pick the largest batch tile that fits the VMEM budget, and a vmem limit."""
    weight_bytes = IN * out_pad * 2                    # bf16, single-buffered
    bias_bytes = out_pad * 4                           # f32, single-buffered

    def need(t):
        x_bytes = 2 * t * IN * 4                       # double-buffered x tiles (f32)
        o_bytes = 2 * t * out_pad * 4                  # double-buffered out tiles (f32)
        tmp_bytes = 3 * t * out_pad * 4                # f32 logits/exp temporaries headroom
        return weight_bytes + bias_bytes + x_bytes + o_bytes + tmp_bytes

    if need(8) > _VMEM_BUDGET:
        # TODO(synk): OUT/IN-tiled online-softmax fallback (running max/denom in
        # VMEM scratch, "arbitrary" reduction axis) for layers whose resident
        # weight does not fit VMEM; not needed at these sizes.
        raise NotImplementedError("weight too large for resident-weight design")

    tb = max(8, min(_round_up(block_b, 8), _round_up(B, 8)))
    while tb > 8 and need(tb) > _VMEM_BUDGET:
        tb = max(8, _round_up(tb // 2, 8))

    vmem_limit = int(min(max(2 * need(tb), 16 * 1024 * 1024), _VMEM_BUDGET))
    return tb, vmem_limit


def linear_softmax(x, weight, bias, *, block_b: int = 512):
    """x: (B, IN) f32; weight: (OUT, IN) f32 (PyTorch layout); bias: (OUT,) f32."""
    B, IN = x.shape
    OUT, IN_w = weight.shape
    assert IN == IN_w and bias.shape == (OUT,)

    # --- lane-dense OUT padding ---------------------------------------------
    # 128 for small layers; multiples of 256 for OUT > 128 (v6e/v7x 2x256 MXU).
    out_pad = 128 if OUT <= 128 else _round_up(OUT, 256)

    # --- resident weight: pre-transpose + cast to bf16 once ------------------
    w_t = weight.T                                     # (IN, OUT)
    if out_pad != OUT:
        w_t = jnp.pad(w_t, ((0, 0), (0, out_pad - OUT)))
        bias = jnp.concatenate(
            [bias, jnp.full((out_pad - OUT,), -1e30, dtype=bias.dtype)])
    w_bf16 = w_t.astype(jnp.bfloat16)                  # (IN, OUT_PAD) bf16
    b2d = bias.reshape(1, out_pad)                     # (1, OUT_PAD) f32

    # --- batch tiling / VMEM budget ------------------------------------------
    tb, vmem_limit = _pick_tb_and_vmem(B, IN, out_pad, block_b)
    b_pad = _round_up(B, tb)
    x_in = x if b_pad == B else jnp.pad(x, ((0, b_pad - B), (0, 0)))

    grid = (pl.cdiv(b_pad, tb),)

    cost = pl.CostEstimate(
        flops=2 * b_pad * IN * out_pad,
        transcendentals=b_pad * out_pad,
        bytes_accessed=(b_pad * IN * 4 + IN * out_pad * 2
                        + out_pad * 4 + b_pad * out_pad * 4),
    )

    out = pl.pallas_call(
        linear_softmax_kernel,
        out_shape=jax.ShapeDtypeStruct((b_pad, out_pad), x.dtype),
        grid=grid,
        in_specs=[
            pl.BlockSpec((tb, IN), lambda i: (i, 0)),            # batch-tiled x
            pl.BlockSpec((IN, out_pad), lambda i: (0, 0),        # resident weight
                         pipeline_mode=pl.Buffered(1)),
            pl.BlockSpec((1, out_pad), lambda i: (0, 0),         # resident bias
                         pipeline_mode=pl.Buffered(1)),
        ],
        out_specs=pl.BlockSpec((tb, out_pad), lambda i: (i, 0)),
        compiler_params=pltpu.CompilerParams(
            dimension_semantics=("parallel",),
            vmem_limit_bytes=vmem_limit,
        ),
        cost_estimate=cost,
    )(x_in, w_bf16, b2d)

    # drop batch / OUT padding only when necessary (each slice is a full HBM pass)
    if b_pad != B or out_pad != OUT:
        out = out[:B, :OUT]
    return out


if __name__ == "__main__":
    key = jax.random.PRNGKey(0)
    B, IN, OUT = 8, 32, 16  # small shapes consistent with nn.Linear(inp, out)

    kx, kw, kb = jax.random.split(key, 3)
    x = jax.random.normal(kx, (B, IN), dtype=jnp.float32)
    bound = 1.0 / (IN ** 0.5)
    weight = jax.random.uniform(kw, (OUT, IN), minval=-bound, maxval=bound,
                                dtype=jnp.float32)
    bias = jax.random.uniform(kb, (OUT,), minval=-bound, maxval=bound,
                              dtype=jnp.float32)

    out = linear_softmax(x, weight, bias)
    out = jax.block_until_ready(out)

    # sanity check vs pure-JAX reference (bf16 MXU inputs => relaxed tolerance)
    ref = jax.nn.softmax(x @ weight.T + bias, axis=1)
    assert out.shape == (B, OUT)
    assert jnp.allclose(out, ref, atol=3e-3, rtol=1e-2), "mismatch vs reference"
    assert jnp.allclose(jnp.sum(out, axis=1), 1.0, atol=1e-3)

    print("KERNEL_OK")
</pallas_src>

<mosaic_0001>
module attributes {stable_mosaic.version = 11 : i64} {
  func.func @linear_softmax_kernel(%arg0: i32, %arg1: memref<8x32xf32, #tpu.memory_space<vmem>>, %arg2: memref<32x128xbf16, #tpu.memory_space<vmem>>, %arg3: memref<1x128xf32, #tpu.memory_space<vmem>>, %arg4: memref<8x128xf32, #tpu.memory_space<vmem>>) attributes {dimension_semantics = [#tpu.dimension_semantics<parallel>], iteration_bounds = array<i64: 1>, scalar_prefetch = 0 : i64, scratch_operands = 0 : i64, tpu.core_type = #tpu.core_type<tc>, window_params = [{transform_indices = @transform_0, window_bounds = array<i64: 8, 32>}, {pipeline_mode = #tpu.pipeline_mode<synchronous>, transform_indices = @transform_1, window_bounds = array<i64: 32, 128>}, {pipeline_mode = #tpu.pipeline_mode<synchronous>, transform_indices = @transform_2, window_bounds = array<i64: 1, 128>}, {transform_indices = @transform_3, window_bounds = array<i64: 8, 128>}]} {
    %c0 = arith.constant 0 : index
    %c0_0 = arith.constant 0 : index
    %0 = vector.load %arg1[%c0, %c0_0] : memref<8x32xf32, #tpu.memory_space<vmem>>, vector<8x32xf32>
    %1 = arith.truncf %0 : vector<8x32xf32> to vector<8x32xbf16>
    %c0_1 = arith.constant 0 : index
    %c0_2 = arith.constant 0 : index
    %2 = vector.load %arg2[%c0_1, %c0_2] : memref<32x128xbf16, #tpu.memory_space<vmem>>, vector<32x128xbf16>
    %cst = arith.constant dense<0.000000e+00> : vector<8x128xf32>
    %3 = tpu.matmul %1, %2, %cst {dimension_numbers = #tpu.dot_dimension_numbers<[1], [0], [0], [1], [0, 0, 1, 1], [], []>} : vector<8x32xbf16>, vector<32x128xbf16>, vector<8x128xf32> -> vector<8x128xf32>
    %c0_3 = arith.constant 0 : index
    %c0_4 = arith.constant 0 : index
    %4 = vector.load %arg3[%c0_3, %c0_4] : memref<1x128xf32, #tpu.memory_space<vmem>>, vector<1x128xf32>
    %5 = vector.broadcast %4 : vector<1x128xf32> to vector<8x128xf32>
    %6 = arith.addf %3, %5 : vector<8x128xf32>
    %cst_5 = arith.constant dense<0xFF800000> : vector<8xf32>
    %7 = vector.multi_reduction <maximumf>, %6, %cst_5 [1] : vector<8x128xf32> to vector<8xf32>
    %8 = vector.shape_cast %7 : vector<8xf32> to vector<8x1xf32>
    %9 = vector.broadcast %8 : vector<8x1xf32> to vector<8x128xf32>
    %10 = arith.subf %6, %9 : vector<8x128xf32>
    %11 = math.exp %10 : vector<8x128xf32>
    %cst_6 = arith.constant dense<0.000000e+00> : vector<8xf32>
    %12 = vector.multi_reduction <add>, %11, %cst_6 [1] : vector<8x128xf32> to vector<8xf32>
    %13 = vector.shape_cast %12 : vector<8xf32> to vector<8x1xf32>
    %14 = tpu.reciprocal %13 {approx = true} : vector<8x1xf32> -> vector<8x1xf32>
    %15 = arith.mulf %13, %14 : vector<8x1xf32>
    %cst_7 = arith.constant 2.000000e+00 : f32
    %16 = vector.broadcast %cst_7 : f32 to vector<8x1xf32>
    %17 = arith.subf %16, %15 : vector<8x1xf32>
    %18 = arith.mulf %14, %17 : vector<8x1xf32>
    %19 = vector.broadcast %18 : vector<8x1xf32> to vector<8x128xf32>
    %20 = arith.mulf %11, %19 : vector<8x128xf32>
    %c0_8 = arith.constant 0 : index
    %c0_9 = arith.constant 0 : index
    %21 = vector.load %arg4[%c0_8, %c0_9] : memref<8x128xf32, #tpu.memory_space<vmem>>, vector<8x128xf32>
    tpu.vector_store %arg4[%c0_8, %c0_9], %20 {strides = array<i32>} : memref<8x128xf32, #tpu.memory_space<vmem>>, vector<8x128xf32>,
    return
  }
  func.func @transform_0(%arg0: i32) -> (i32, i32) {
    %c0_i32 = arith.constant 0 : i32
    %c0_i32_0 = arith.constant 0 : i32
    return %arg0, %c0_i32 : i32, i32
  }
  func.func @transform_1(%arg0: i32) -> (i32, i32) {
    %c0_i32 = arith.constant 0 : i32
    %c0_i32_0 = arith.constant 0 : i32
    %c0_i32_1 = arith.constant 0 : i32
    return %c0_i32, %c0_i32_0 : i32, i32
  }
  func.func @transform_2(%arg0: i32) -> (i32, i32) {
    %c0_i32 = arith.constant 0 : i32
    %c0_i32_0 = arith.constant 0 : i32
    %c0_i32_1 = arith.constant 0 : i32
    return %c0_i32, %c0_i32_0 : i32, i32
  }
  func.func @transform_3(%arg0: i32) -> (i32, i32) {
    %c0_i32 = arith.constant 0 : i32
    %c0_i32_0 = arith.constant 0 : i32
    return %arg0, %c0_i32 : i32, i32
  }
}

</mosaic_0001>

<bundles_post_ra>
// kernel: tpu_custom_call.1
= control target key start
LH: loop header
LB: loop body
LE: loop exit
PB: predicated region body
PF: predicated region fallthrough
CT: control target
= control target key end

     0   :  { %8 = vsyncpa [#allocation3], 0  ;;  %s313_s0 = inlined_call_operand.hbm [shape: f32[8,32], index: 0, kind: input, shape index: {}]   ;;  %s314_s1 = inlined_call_operand.hbm [shape: bf16[32,128], index: 1, kind: input, shape index: {}]   ;;  %s315_s2 = inlined_call_operand.vmem [shape: f32[1,128], index: 2, kind: input, shape index: {}]   ;;  %s316_s3 = inlined_call_operand.hbm [shape: f32[8,128], index: 3, kind: output, shape index: {}]  }
   0x1   :  { %9 = vsyncpa [#allocation6], 0 }
   0x2   :  { %10 = vsyncpa [#allocation4], 0  ;;  %s240_s12 = smov [#allocation2]   ;;  %s241_s14 = smov [#allocation5]  }
   0x3   :  { %s17_s13 = sshll.u32 %s240_s12, 4  ;;  %s26_s15 = sshll.u32 %s241_s14, 4  ;;  %s18_s13 = int_to_ptr.vmem [resolvable:$true] %s17_s13  ;;  %s267_s15 = int_to_ptr.vmem [resolvable:$true] %s26_s15 }
   0x4   :  { %s168_s18 = scalar_lea.hbm %s313_s0, 128 }
   0x5   :  { %p169_p0 = scmp.ne.s32.totalorder %s313_s0, %s168_s18  ;;  %p172_p1 = scmp.lt.u32.totalorder %s168_s18, %s313_s0 }
   0x7   :  { %p174_p2 = pnand %p172_p1, %p169_p0 }
   0x9   :  { %177 = shalt.err (!%p174_p2)
}
   0xa   :  { %s178_s23 = scalar_lea.vmem %s18_s13, 128  ;;  %p183_p4 = scmp.lt.s32.totalorder %s18_s13, %s18_s13 }
   0xb   :  { %p179_p3 = scmp.ne.s32.totalorder %s18_s13, %s178_s23  ;;  %p184_p5 = scmp.lt.s32.totalorder %s178_s23, %s178_s23 }
   0xd   :  { %p185_p6 = por %p184_p5, %p183_p4 }
   0xf   :  { %p186_p7 = pnand %p185_p6, %p179_p3 }
  0x11   :  { %189 = shalt.err (!%p186_p7)
}
  0x12   :  { %20 = dma.hbm_to_vmem [thread:$0]  %s313_s0, 128, %s18_s13, [#allocation3]  }
  0x13   :  { %s190_s28 = scalar_lea.hbm %s314_s1, 256 }
  0x14   :  { %p191_p8 = scmp.ne.s32.totalorder %s314_s1, %s190_s28  ;;  %p194_p9 = scmp.lt.u32.totalorder %s190_s28, %s314_s1 }
  0x16   :  { %p196_p10 = pnand %p194_p9, %p191_p8 }
  0x18   :  { %199 = shalt.err (!%p196_p10)
}
  0x19   :  { %s200_s6 = scalar_lea.vmem %s267_s15, 256  ;;  %p205_p12 = scmp.lt.s32.totalorder %s267_s15, %s267_s15 }
  0x1a   :  { %p201_p11 = scmp.ne.s32.totalorder %s267_s15, %s200_s6  ;;  %p206_p13 = scmp.lt.s32.totalorder %s200_s6, %s200_s6 }
  0x1c   :  { %p207_p0 = por %p206_p13, %p205_p12 }
  0x1e   :  { %p208_p1 = pnand %p207_p0, %p201_p11 }
  0x20   :  { %211 = shalt.err (!%p208_p1)
}
  0x21   :  { %s242_s0 = smov 64   ;;  %s243_s7 = smov 4  }
  0x22   :  { %32 = dma.hbm_to_vmem [thread:$0]  %s314_s1, 256, %s267_s15, [#allocation6], %s242_s0, %s242_s0, %s243_s7  }
  0x23   :  { %234 = dma.done.wait [#allocation3], 128  }
  0x24   :  { %235 = vsyncadd [#allocation3], 4294967168 }
  0x25   :  { %236 = dma.done.wait [#allocation6], 256  }
  0x26   :  { %237 = vsyncadd [#allocation6], 4294967040  ;;  %v244_v0 = vmov 0.0   ;;  %vm245_vm0 = vmmov 0   ;;  %v162_v1 = vld [vmem:[#allocation5] sm:$0xff]   ;;  %v163_v2 = vld [vmem:[#allocation5 + $0x8] sm:$0xff]  }
  0x27   :  { %147 = vmatprep.subr.bf16.mxu0 %v244_v0  ;;  %151 = vmatprep.mubr.msk.bf16.mxu0 %vm245_vm0, %v244_v0  ;;  %v42_v3 = vld [vmem:[#allocation2] sm:$0xff]  ;;  %vm67_vm1 = vcmask 261120   ;;  %s246_s1 = smov [#allocation7]  }
  0x28   :  { %148 = vmatpush3.bf16.msra.mxu0 %v162_v1  ;;  %v43_v4 = vpack.c.bf16 %v42_v3, %v42_v3  ;;  %v140_v5 = vld [vmem:[%s315_s2] ss:$0 sm:$0xff]  ;;  %s130_s12 = sshll.u32 %s246_s1, 4  ;;  %s131_s12 = int_to_ptr.vmem [resolvable:$true] %s130_s12 }
  0x29   :  { %149 = vmatprep.subr.bf16.mxu0 %v244_v0  ;;  %s212_s2 = scalar_lea.vmem %s131_s12, 128  ;;  %p217_p3 = scmp.lt.s32.totalorder %s131_s12, %s131_s12 }
  0x2a   :  { %p213_p2 = scmp.ne.s32.totalorder %s131_s12, %s212_s2  ;;  %p218_p4 = scmp.lt.s32.totalorder %s212_s2, %s212_s2 }
  0x2c   :  { %150 = vmatpush3.bf16.msra.mxu0 %v163_v2  ;;  %p219_p5 = por %p218_p4, %p217_p3 }
  0x2e   :  { %p220_p6 = pnand %p219_p5, %p213_p2 }
  0x2f   :  { %152 = vmatmul.mubr.msk.bf16.vlgmr.msra.gmra.mrb[0].mxu0 %vm67_vm1, %v43_v4 }
 0x102   :  { %v105_v6 = vpop.f32.mrb[0].mxu0 }
 0x103   :  { %v106_v7 = vadd.f32 %v140_v5, %v105_v6  ;;  %v153_v8 = vpop.f32.mrb[1].mxu0 }
 0x104   :  { %v108_v9 = vpop.f32.mrb[2].mxu0 }
 0x105   :  { %111 = vmax.xlane.f32.xlu0 %v106_v7  ;;  %v154_v10 = vpop.f32.mrb[3].mxu0 }
 0x192   :  { %v112_v11 = vpop.xlane.xlu0 %111 }
 0x193   :  { %v113_v12 = vsub.f32 %v106_v7, %v112_v11 }
 0x195   :  { %v114_v13 = vmul.f32 1.442695, %v113_v12 }
 0x197   :  { %164 = vpow2.f32 %v114_v13 }
 0x1a1   :  { %v165_v14 = vpop.eup %164 }
 0x1a2   :  { %116 = vadd.xlane.f32.xlu0 %v165_v14 }
 0x22f   :  { %v117_v15 = vpop.xlane.xlu0 %116 }
 0x230   :  { %166 = vrcp.f32 %v117_v15 }
 0x23a   :  { %v167_v16 = vpop.eup %166 }
 0x23b   :  { %v119_v17 = vmul.f32 %v167_v16, %v117_v15 }
 0x23d   :  { %v120_v18 = vsub.f32 2.0, %v119_v17 }
 0x23f   :  { %v121_v19 = vmul.f32 %v167_v16, %v120_v18 }
 0x241   :  { %v122_v20 = vmul.f32 %v165_v14, %v121_v19 }
 0x243   :  { %123 = vst [vmem:[#allocation7] sm:$0xff] %v122_v20 }
 0x244   :  { %223 = shalt.err (!%p220_p6)
}
 0x245   :  { %s224_s15 = scalar_lea.hbm %s316_s3, 128 }
 0x246   :  { %p225_p7 = scmp.ne.s32.totalorder %s316_s3, %s224_s15  ;;  %p228_p8 = scmp.lt.u32.totalorder %s224_s15, %s316_s3 }
 0x248   :  { %p230_p9 = pnand %p228_p8, %p225_p7 }
 0x24a   :  { %233 = shalt.err (!%p230_p9)
}
 0x24b   :  { %133 = dma.vmem_to_hbm [thread:$0]  %s131_s12, 128, %s316_s3, [#allocation4]  }
 0x24c   :  { %238 = dma.done.wait [#allocation4], 128  }
 0x24d   :  { %239 = vsyncadd [#allocation4], 4294967168 }
 0x24e   :  { %137 = vsyncpa [#allocation3], 1 }
 0x24f   :  { %138 = vsyncpa [#allocation6], 1 }
 0x250   :  { %139 = vsyncpa [#allocation4], 1 }

</bundles_post_ra>
